<compile_context>
chip_gen: v6e
topology: v6e:2x2x1
jax: 0.10.0
libtpu: 0.0.40
codegen_flags: <defaults>
</compile_context>

<pallas_src>
import functools

import jax
import jax.numpy as jnp
import numpy as np
from jax import lax
from jax.experimental import pallas as pl
from jax.experimental.pallas import tpu as pltpu


def fused_kernel(B, I, G, H, E, V, offs,
                 item_ref, genres_ref, p_ref,
                 out_ref, reg_ref):
    # ---- static, sublane-aligned views into the packed parameter buffer ---
    w_hid = p_ref[offs["w_hid"]:offs["w_hid"] + G, 0:H]   # (G, H)
    w_out = p_ref[offs["w_out"]:offs["w_out"] + H, 0:G]   # (H, G)
    w_reg = p_ref[offs["w_reg"]:offs["w_reg"] + E, 0:H]   # (E, H)
    embd = p_ref[offs["embd"]:offs["embd"] + V, 0:E]      # (V, E)
    b_hid = p_ref[offs["b_hid"]:offs["b_hid"] + 1, 0:H]   # (1, H)
    b_out = p_ref[offs["b_out"]:offs["b_out"] + 1, 0:G]   # (1, G)
    b_reg = p_ref[offs["b_reg"]:offs["b_reg"] + 1, 0:H]   # (1, H)

    # ---- genre branch: hid -> (dropout = identity) -> relu -> out -> relu -
    g = genres_ref[...]                                                      # (B, G)
    g_hid = jnp.dot(g, w_hid, preferred_element_type=jnp.float32) + b_hid    # (B, H)
    h = jnp.maximum(g_hid, 0.0)
    o = jnp.dot(h, w_out, preferred_element_type=jnp.float32) + b_out        # (B, G)
    out_ref[...] = jnp.maximum(o, 0.0)

    # ---- reg branch: fused embedding gather via exact one-hot matmul ------
    # Fold the per-token linear into the (tiny) table first:
    v2h = jnp.dot(embd, w_reg, preferred_element_type=jnp.float32)           # (V, H)

    ids = item_ref[...]                                          # (B*I, 1) int32
    vocab_iota = lax.broadcasted_iota(jnp.int32, (B * I, V), 1)  # (B*I, V)
    onehot = (vocab_iota == ids).astype(jnp.float32)             # (B*I, V)
    item_h = jnp.dot(onehot, v2h, preferred_element_type=jnp.float32) + b_reg  # (B*I, H)

    # torch-style (B, I, H) - (B, H) broadcast (requires I == B), kept 2-D:
    # row k = b*I + i of item_h pairs with g_hid[k mod B] == g_hid[i].
    g_rep = jnp.concatenate([g_hid] * I, axis=0)                 # (I*B, H)
    diff = item_h - g_rep
    reg_ref[0, 0] = jnp.sum(diff * diff) * (1.0 / float(B * I * H))


def pack_params(params):
    """One-time host-side packing of all weights into a single VMEM buffer.

    Each piece's row count is padded to a multiple of 8 so all in-kernel
    slices are sublane-aligned; columns are padded to a common width C.
    """
    w_hid = jnp.asarray(params["w_hid"], jnp.float32)       # (G, H)
    w_out = jnp.asarray(params["w_out"], jnp.float32)       # (H, G)
    w_reg = jnp.asarray(params["w_reg"], jnp.float32)       # (E, H)
    embd = jnp.asarray(params["embd_item"], jnp.float32)    # (V, E)
    b_hid = jnp.asarray(params["b_hid"], jnp.float32).reshape(1, -1)
    b_out = jnp.asarray(params["b_out"], jnp.float32).reshape(1, -1)
    b_reg = jnp.asarray(params["b_reg"], jnp.float32).reshape(1, -1)

    G, H = w_hid.shape
    E = w_reg.shape[0]
    V = embd.shape[0]
    C = max(H, G, E)

    pieces = [("w_hid", w_hid), ("w_out", w_out), ("w_reg", w_reg),
              ("embd", embd), ("b_hid", b_hid), ("b_out", b_out),
              ("b_reg", b_reg)]

    offsets = {}
    rows = []
    off = 0
    for name, x in pieces:
        offsets[name] = off
        xp = jnp.pad(x, ((0, (-x.shape[0]) % 8), (0, C - x.shape[1])))
        rows.append(xp)
        off += xp.shape[0]

    packed = jnp.concatenate(rows, axis=0)                   # (rows_padded, C)
    dims = {"G": G, "H": H, "E": E, "V": V, "C": C, "offsets": offsets}
    return packed, dims


def model_forward(item, genres, packed, dims):
    """item: (B, I) int32 indices, genres: (B, G) float32."""
    B, I = item.shape
    G, H, E, V = dims["G"], dims["H"], dims["E"], dims["V"]
    offs = dims["offsets"]
    # The torch broadcast (B, I, H) - (B, H) in the reference only works when
    # the per-row item count equals the batch size.
    assert I == B, "reg-term broadcast requires item.shape[1] == batch_size"

    item_flat = item.reshape(B * I, 1).astype(jnp.int32)
    genres = genres.astype(jnp.float32)

    kern = functools.partial(fused_kernel, B, I, G, H, E, V, offs)
    vmem = pltpu.MemorySpace.VMEM
    smem = pltpu.MemorySpace.SMEM

    flops = (2 * (B * G * H + B * H * G + V * E * H + B * I * V * H)
             + 3 * B * I * H)
    bytes_accessed = 4 * (item_flat.size + genres.size + packed.size + B * G + 1)

    out, reg = pl.pallas_call(
        kern,
        out_shape=(
            jax.ShapeDtypeStruct((B, G), jnp.float32),
            jax.ShapeDtypeStruct((1, 1), jnp.float32),
        ),
        in_specs=[
            pl.BlockSpec(memory_space=vmem),   # item indices
            pl.BlockSpec(memory_space=vmem),   # genres
            pl.BlockSpec(memory_space=vmem),   # packed weights/biases/embedding
        ],
        out_specs=(
            pl.BlockSpec(memory_space=vmem),   # out (B, G)
            pl.BlockSpec(memory_space=smem),   # reg scalar
        ),
        cost_estimate=pl.CostEstimate(
            flops=flops, transcendentals=0, bytes_accessed=bytes_accessed),
    )(item_flat, genres, packed)

    return out, reg[0, 0]


def reference_forward(item, genres, params):
    """Pure-JAX reference mirroring the PyTorch module (eval mode)."""
    g_hid = genres @ params["w_hid"] + params["b_hid"]
    h = jnp.maximum(g_hid, 0.0)
    out = jnp.maximum(h @ params["w_out"] + params["b_out"], 0.0)
    item_e = params["embd_item"][item]                      # (B, I, E)
    item_h = item_e @ params["w_reg"] + params["b_reg"]     # (B, I, H)
    reg = jnp.mean((item_h - g_hid) ** 2)                   # torch-style broadcast
    return out, reg


if __name__ == "__main__":
    # Small config consistent with the module: the reference broadcasting
    # requires item sequence length == batch size (== item_size here).
    batch = 8
    item_size = 8      # embedding vocab AND per-row item count
    genre_size = 16
    hid_dim = 32
    embd_dim = 16

    key = jax.random.PRNGKey(0)
    keys = jax.random.split(key, 10)

    params = {
        "embd_item": jax.random.normal(keys[0], (item_size, embd_dim), jnp.float32) * 0.1,
        "w_hid": jax.random.normal(keys[1], (genre_size, hid_dim), jnp.float32) * 0.1,
        "b_hid": jax.random.normal(keys[2], (1, hid_dim), jnp.float32) * 0.1,
        "w_out": jax.random.normal(keys[3], (hid_dim, genre_size), jnp.float32) * 0.1,
        "b_out": jax.random.normal(keys[4], (1, genre_size), jnp.float32) * 0.1,
        "w_reg": jax.random.normal(keys[5], (embd_dim, hid_dim), jnp.float32) * 0.1,
        "b_reg": jax.random.normal(keys[6], (1, hid_dim), jnp.float32) * 0.1,
    }

    item = jax.random.randint(keys[7], (batch, item_size), 0, item_size, dtype=jnp.int32)
    genres = jax.random.normal(keys[8], (batch, genre_size), jnp.float32)

    packed, dims = pack_params(params)   # one-time host-side packing

    out, reg = model_forward(item, genres, packed, dims)
    out = jax.block_until_ready(out)
    reg = jax.block_until_ready(reg)

    out_ref, reg_ref = reference_forward(item, genres, params)
    np.testing.assert_allclose(np.asarray(out), np.asarray(out_ref), rtol=1e-5, atol=1e-5)
    np.testing.assert_allclose(np.asarray(reg), np.asarray(reg_ref), rtol=1e-5, atol=1e-5)

    print("KERNEL_OK")
</pallas_src>

<mosaic_0001>
module attributes {stable_mosaic.version = 11 : i64} {
  func.func @fused_kernel(%arg0: memref<64x1xi32, #tpu.memory_space<vmem>>, %arg1: memref<8x16xf32, #tpu.memory_space<vmem>>, %arg2: memref<96x32xf32, #tpu.memory_space<vmem>>, %arg3: memref<8x16xf32, #tpu.memory_space<vmem>>, %arg4: memref<1x1xf32, #tpu.memory_space<smem>>) attributes {dimension_semantics = [], scalar_prefetch = 0 : i64, scratch_operands = 0 : i64, tpu.core_type = #tpu.core_type<tc>} {
    %c0 = arith.constant 0 : index
    %c0_0 = arith.constant 0 : index
    %0 = vector.load %arg2[%c0, %c0_0] : memref<96x32xf32, #tpu.memory_space<vmem>>, vector<16x32xf32>
    %c16 = arith.constant 16 : index
    %c0_1 = arith.constant 0 : index
    %1 = vector.load %arg2[%c16, %c0_1] : memref<96x32xf32, #tpu.memory_space<vmem>>, vector<32x16xf32>
    %c48 = arith.constant 48 : index
    %c0_2 = arith.constant 0 : index
    %2 = vector.load %arg2[%c48, %c0_2] : memref<96x32xf32, #tpu.memory_space<vmem>>, vector<16x32xf32>
    %c64 = arith.constant 64 : index
    %c0_3 = arith.constant 0 : index
    %3 = vector.load %arg2[%c64, %c0_3] : memref<96x32xf32, #tpu.memory_space<vmem>>, vector<8x16xf32>
    %c72 = arith.constant 72 : index
    %c0_4 = arith.constant 0 : index
    %4 = vector.load %arg2[%c72, %c0_4] : memref<96x32xf32, #tpu.memory_space<vmem>>, vector<1x32xf32>
    %c80 = arith.constant 80 : index
    %c0_5 = arith.constant 0 : index
    %5 = vector.load %arg2[%c80, %c0_5] : memref<96x32xf32, #tpu.memory_space<vmem>>, vector<1x16xf32>
    %c88 = arith.constant 88 : index
    %c0_6 = arith.constant 0 : index
    %6 = vector.load %arg2[%c88, %c0_6] : memref<96x32xf32, #tpu.memory_space<vmem>>, vector<1x32xf32>
    %c0_7 = arith.constant 0 : index
    %c0_8 = arith.constant 0 : index
    %7 = vector.load %arg1[%c0_7, %c0_8] : memref<8x16xf32, #tpu.memory_space<vmem>>, vector<8x16xf32>
    %cst = arith.constant dense<0.000000e+00> : vector<8x32xf32>
    %8 = tpu.matmul %7, %0, %cst {dimension_numbers = #tpu.dot_dimension_numbers<[1], [0], [0], [1], [0, 0, 1, 1], [], []>} : vector<8x16xf32>, vector<16x32xf32>, vector<8x32xf32> -> vector<8x32xf32>
    %9 = vector.broadcast %4 : vector<1x32xf32> to vector<8x32xf32>
    %10 = arith.addf %8, %9 : vector<8x32xf32>
    %cst_9 = arith.constant 0.000000e+00 : f32
    %11 = vector.broadcast %cst_9 : f32 to vector<8x32xf32>
    %12 = arith.maximumf %10, %11 : vector<8x32xf32>
    %cst_10 = arith.constant dense<0.000000e+00> : vector<8x16xf32>
    %13 = tpu.matmul %12, %1, %cst_10 {dimension_numbers = #tpu.dot_dimension_numbers<[1], [0], [0], [1], [0, 0, 1, 1], [], []>} : vector<8x32xf32>, vector<32x16xf32>, vector<8x16xf32> -> vector<8x16xf32>
    %14 = vector.broadcast %5 : vector<1x16xf32> to vector<8x16xf32>
    %15 = arith.addf %13, %14 : vector<8x16xf32>
    %cst_11 = arith.constant 0.000000e+00 : f32
    %16 = vector.broadcast %cst_11 : f32 to vector<8x16xf32>
    %17 = arith.maximumf %15, %16 : vector<8x16xf32>
    %c0_12 = arith.constant 0 : index
    %c0_13 = arith.constant 0 : index
    %18 = vector.load %arg3[%c0_12, %c0_13] : memref<8x16xf32, #tpu.memory_space<vmem>>, vector<8x16xf32>
    tpu.vector_store %arg3[%c0_12, %c0_13], %17 {strides = array<i32>} : memref<8x16xf32, #tpu.memory_space<vmem>>, vector<8x16xf32>,
    %cst_14 = arith.constant dense<0.000000e+00> : vector<8x32xf32>
    %19 = tpu.matmul %3, %2, %cst_14 {dimension_numbers = #tpu.dot_dimension_numbers<[1], [0], [0], [1], [0, 0, 1, 1], [], []>} : vector<8x16xf32>, vector<16x32xf32>, vector<8x32xf32> -> vector<8x32xf32>
    %c0_15 = arith.constant 0 : index
    %c0_16 = arith.constant 0 : index
    %20 = vector.load %arg0[%c0_15, %c0_16] : memref<64x1xi32, #tpu.memory_space<vmem>>, vector<64x1xi32>
    %21 = tpu.iota {dimensions = array<i32: 1>} : vector<64x8xi32>
    %22 = vector.broadcast %20 : vector<64x1xi32> to vector<64x8xi32>
    %23 = arith.cmpi eq, %21, %22 : vector<64x8xi32>
    %24 = arith.extui %23 : vector<64x8xi1> to vector<64x8xi32>
    %25 = arith.sitofp %24 : vector<64x8xi32> to vector<64x8xf32>
    %cst_17 = arith.constant dense<0.000000e+00> : vector<64x32xf32>
    %26 = tpu.matmul %25, %19, %cst_17 {dimension_numbers = #tpu.dot_dimension_numbers<[1], [0], [0], [1], [0, 0, 1, 1], [], []>} : vector<64x8xf32>, vector<8x32xf32>, vector<64x32xf32> -> vector<64x32xf32>
    %27 = vector.broadcast %6 : vector<1x32xf32> to vector<64x32xf32>
    %28 = arith.addf %26, %27 : vector<64x32xf32>
    %29 = tpu.concatenate %10, %10, %10, %10, %10, %10, %10, %10 in 0 : vector<8x32xf32>, vector<8x32xf32>, vector<8x32xf32>, vector<8x32xf32>, vector<8x32xf32>, vector<8x32xf32>, vector<8x32xf32>, vector<8x32xf32> -> vector<64x32xf32>
    %30 = arith.subf %28, %29 : vector<64x32xf32>
    %31 = arith.mulf %30, %30 : vector<64x32xf32>
    %32 = vector.shape_cast %31 : vector<64x32xf32> to vector<1x64x32xf32>
    %cst_18 = arith.constant dense<0.000000e+00> : vector<1xf32>
    %33 = vector.multi_reduction <add>, %32, %cst_18 [1, 2] : vector<1x64x32xf32> to vector<1xf32>
    %34 = vector.shape_cast %33 : vector<1xf32> to vector<1x1x1xf32>
    %35 = vector.extract %34[0, 0, 0] : f32 from vector<1x1x1xf32>
    %cst_19 = arith.constant 4.8828125E-4 : f32
    %36 = arith.mulf %35, %cst_19 : f32
    %c0_20 = arith.constant 0 : index
    %c0_21 = arith.constant 0 : index
    %37 = memref.load %arg4[%c0_20, %c0_21] : memref<1x1xf32, #tpu.memory_space<smem>>
    memref.store %36, %arg4[%c0_20, %c0_21] : memref<1x1xf32, #tpu.memory_space<smem>>
    return
  }
}

</mosaic_0001>

<bundles_post_ra>
// kernel: tpu_custom_call.1
= control target key start
LH: loop header
LB: loop body
LE: loop exit
PB: predicated region body
PF: predicated region fallthrough
CT: control target
= control target key end

     0   :  { %10 = vsyncpa [#allocation3], 0  ;;  %v649_v1 = vmov 0.0   ;;  %vm650_vm0 = vmmov 0   ;;  %vm35_vm1 = vcmask 130048   ;;  %v651_v4 = vmov 0   ;;  %s801_s0 = inlined_call_operand.vmem [shape: s32[64,1], index: 0, kind: input, shape index: {}]   ;;  %s802_s1 = inlined_call_operand.vmem [shape: f32[8,16], index: 1, kind: input, shape index: {}]   ;;  %s803_s2 = inlined_call_operand.vmem [shape: f32[96,32], index: 2, kind: input, shape index: {}]   ;;  %s804_s3 = inlined_call_operand.hbm [shape: f32[8,16], index: 3, kind: output, shape index: {0}]   ;;  %s805_s4 = inlined_call_operand.hbm [shape: f32[1,1], index: 4, kind: output, shape index: {1}]  }
   0x1   :  { %v19_v0 = vld [vmem:[%s803_s2 + $0x8] sm:$0xff]  ;;  %567 = vmatprep.subr.mxu0 %v649_v1  ;;  %v18_v2 = vld [vmem:[%s803_s2] sm:$0xff]  ;;  %571 = vmatprep.mubr.msk.f32.mxu0 %vm650_vm0, %v649_v1  ;;  %v25_v6 = vld [vmem:[%s803_s2 + $0x38] sm:$0xff] }
   0x2   :  { %568 = vmatpush3.msra.mxu0 %v19_v0  ;;  %v30_v3 = vld [vmem:[%s802_s1] sm:$0xff]  ;;  %615 = vset.pattern.permute.xlu0 %v651_v4  ;;  %v265_v7 = vld [vmem:[%s801_s0 + $0x10] sm:$0xff] }
   0x3   :  { %v263_v5 = vld [vmem:[%s801_s0] sm:$0xff]  ;;  %569 = vmatprep.subr.mxu0 %v649_v1  ;;  %616 = vset.pattern.permute.xlu1 %v651_v4 }
   0x4   :  { %274 = vperm.xlu0 %615, %v263_v5   ;;  %570 = vmatpush3.msra.mxu0 %v18_v2 }
   0x5   :  { %11 = vsyncpa [#allocation4], 0  ;;  %572 = vmatmul.mubr.msk.f32.vlgmr.msra.gmra.mxu0 %vm35_vm1, %v30_v3  ;;  %585 = vmatprep.subr.mxu0 %v649_v1  ;;  %v24_v8 = vld [vmem:[%s803_s2 + $0x30] sm:$0xff]  ;;  %v264_v9 = vld [vmem:[%s801_s0 + $0x8] sm:$0xff]  ;;  %v271_v20 = vlaneseq  ;;  %vm325_vm2 = vcmask 64512   ;;  %vm114_vm4 = vcmask 261120  }
   0x6   :  { %586 = vmatpush3.msra.mxu0 %v25_v6  ;;  %589 = vmatprep.mubr.msk.f32.mxu0 %vm650_vm0, %v649_v1  ;;  %v26_v10 = vld [vmem:[%s803_s2 + $0x40] sm:$0xff]  ;;  %v23_v11 = vld [vmem:[%s803_s2 + $0x28] sm:$0xff]  ;;  %v266_v12 = vld [vmem:[%s801_s0 + $0x18] sm:$0xff] }
   0x7   :  { %587 = vmatprep.subr.mxu0 %v649_v1  ;;  %280 = vperm.xlu1 %616, %v265_v7   ;;  %v267_v13 = vld [vmem:[%s801_s0 + $0x20] sm:$0xff]  ;;  %v268_v14 = vld [vmem:[%s801_s0 + $0x28] sm:$0xff]  ;;  %v269_v15 = vld [vmem:[%s801_s0 + $0x30] sm:$0xff]  ;;  %v272_v21 = vand.u32 127, %v271_v20 }
   0x8   :  { %588 = vmatpush3.msra.mxu0 %v24_v8  ;;  %277 = vperm.xlu0 %615, %v264_v9   ;;  %v270_v16 = vld [vmem:[%s801_s0 + $0x38] sm:$0xff]  ;;  %v22_v17 = vld [vmem:[%s803_s2 + $0x20] sm:$0xff]  ;;  %v20_v19 = vld [vmem:[%s803_s2 + $0x10] sm:$0xff] }
   0x9   :  { %590 = vmatmul.mubr.msk.f32.vlgmr.msra.gmra.mxu0 %vm35_vm1, %v26_v10  ;;  %574 = vmatprep.subr.mxu1 %v649_v1  ;;  %v21_v18 = vld [vmem:[%s803_s2 + $0x18] sm:$0xff]  ;;  %v525_v28 = vld [vmem:[%s803_s2 + $0x48] ss:$0 sm:$0xff]  ;;  %v527_v45 = vld [vmem:[%s803_s2 + $0x50] ss:$0 sm:$0xff] }
   0xa   :  { %575 = vmatpush3.msra.mxu1 %v23_v11  ;;  %582 = vmatprep.mubr.msk.f32.mxu1 %vm650_vm0, %v649_v1  ;;  %v538_v48 = vld [vmem:[%s803_s2 + $0x58] ss:$0 sm:$0xff]  ;;  %s652_s2 = smov [#allocation2]  }
   0xb   :  { %283 = vperm.xlu1 %616, %v266_v12   ;;  %576 = vmatprep.subr.mxu1 %v649_v1  ;;  %s504_s28 = sshll.u32 %s652_s2, 4  ;;  %s505_s28 = int_to_ptr.vmem [resolvable:$true] %s504_s28 }
   0xc   :  { %286 = vperm.xlu0 %615, %v267_v13   ;;  %577 = vmatpush3.msra.mxu1 %v22_v17  ;;  %s617_s29 = scalar_lea.vmem %s505_s28, 128  ;;  %p622_p1 = scmp.lt.s32.totalorder %s505_s28, %s505_s28 }
   0xd   :  { %578 = vmatprep.subr.mxu1 %v649_v1  ;;  %p618_p0 = scmp.ne.s32.totalorder %s505_s28, %s617_s29  ;;  %p623_p2 = scmp.lt.s32.totalorder %s617_s29, %s617_s29 }
   0xe   :  { %579 = vmatpush3.msra.mxu1 %v21_v18 }
   0xf   :  { %289 = vperm.xlu1 %616, %v268_v14   ;;  %580 = vmatprep.subr.mxu1 %v649_v1  ;;  %p624_p3 = por %p623_p2, %p622_p1 }
  0x10   :  { %292 = vperm.xlu0 %615, %v269_v15   ;;  %581 = vmatpush3.msra.mxu1 %v20_v19 }
  0x11   :  { %p625_p4 = pnand %p624_p3, %p618_p0 }
  0x13   :  { %295 = vperm.xlu1 %616, %v270_v16  }
  0x7f   :  { %v275_v22 = vpop.permute.xlu0 %274 }
  0x80   :  { %vm297_vm3 = vcmp.eq.s32.totalorder %v272_v21, %v275_v22 }
  0x81   :  { %v530_v23 = vsel %vm297_vm3, 1.0, %v649_v1 }
  0x82   :  { %594 = vmatprep.mubr.msk.f32.mxu0 %vm325_vm2, %v530_v23  ;;  %v281_v24 = vpop.permute.xlu1 %280 }
  0x83   :  { %v278_v25 = vpop.permute.xlu0 %277  ;;  %vm299_vm5 = vcmp.eq.s32.totalorder %v272_v21, %v281_v24 }
  0x84   :  { %vm298_vm7 = vcmp.eq.s32.totalorder %v272_v21, %v278_v25  ;;  %v532_v36 = vsel %vm299_vm5, 1.0, %v649_v1 }
  0x85   :  { %v531_v40 = vsel %vm298_vm7, 1.0, %v649_v1 }
  0x86   :  { %v284_v26 = vpop.permute.xlu1 %283 }
  0x87   :  { %v287_v27 = vpop.permute.xlu0 %286  ;;  %vm300_vm10 = vcmp.eq.s32.totalorder %v272_v21, %v284_v26 }
  0x88   :  { %vm301_vm6 = vcmp.eq.s32.totalorder %v272_v21, %v287_v27  ;;  %v533_v43 = vsel %vm300_vm10, 1.0, %v649_v1 }
  0x89   :  { %v534_v37 = vsel %vm301_vm6, 1.0, %v649_v1 }
  0x8a   :  { %v290_v30 = vpop.permute.xlu1 %289 }
  0x8b   :  { %v293_v33 = vpop.permute.xlu0 %292  ;;  %vm302_vm8 = vcmp.eq.s32.totalorder %v272_v21, %v290_v30 }
  0x8c   :  { %vm303_vm9 = vcmp.eq.s32.totalorder %v272_v21, %v293_v33  ;;  %v535_v41 = vsel %vm302_vm8, 1.0, %v649_v1 }
  0x8d   :  { %v536_v42 = vsel %vm303_vm9, 1.0, %v649_v1 }
  0x8e   :  { %v296_v39 = vpop.permute.xlu1 %295 }
  0x8f   :  { %vm304_vm11 = vcmp.eq.s32.totalorder %v272_v21, %v296_v39 }
  0x90   :  { %v537_v44 = vsel %vm304_vm11, 1.0, %v649_v1 }
  0xc5   :  { %v105_v29 = vpop.f32.mrf.mxu0 }
  0xc6   :  { %v754_v31 = vadd.f32 %v525_v28, %v105_v29 }
  0xc7   :  { %v573_v32 = vpop.f32.mrf.mxu0 }
  0xc8   :  { %v109_v34 = vmax.f32 %v754_v31, 0.0 }
  0xc9   :  { %v259_v35 = vpop.f32.mrf.mxu0 }
  0xca   :  { %583 = vmatmul.mubr.msk.f32.vlgmr.msra.gmra.mxu1 %vm114_vm4, %v109_v34  ;;  %592 = vmatprep.subr.mxu0 %v259_v35 }
  0xcb   :  { %606 = vmatprep.subr.mxu1 %v259_v35  ;;  %v591_v38 = vpop.f32.mrf.mxu0  ;;  %593 = vmatpush3.msra.mxu0 %v259_v35 }
  0xcc   :  { %607 = vmatpush3.msra.mxu1 %v259_v35  ;;  %600 = vmatprep.mubr.msk.f32.mxu1 %vm325_vm2, %v534_v37 }
  0xcd   :  { %595 = vmatmul.mubr.msk.f32.vlgmr.msra.gmra.mxu0 %vm325_vm2, %v531_v40 }
  0xce   :  { %601 = vmatmul.mubr.msk.f32.vlgmr.msra.gmra.mxu1 %vm325_vm2, %v535_v41  ;;  %597 = vmatprep.mubr.msk.f32.mxu0 %vm325_vm2, %v532_v36 }
  0xcf   :  { %603 = vmatprep.mubr.msk.f32.mxu1 %vm325_vm2, %v536_v42 }
  0xd1   :  { %598 = vmatmul.mubr.msk.f32.gmra.mxu0 %vm325_vm2, %v533_v43 }
  0xd2   :  { %604 = vmatmul.mubr.msk.f32.gmra.mxu1 %vm325_vm2, %v537_v44 }
 0x18a   :  { %v184_v46 = vpop.f32.mrf.mxu1 }
 0x18b   :  { %v185_v47 = vadd.f32 %v527_v45, %v184_v46 }
 0x18c   :  { %v584_v49 = vpop.f32.mrf.mxu1 }
 0x18d   :  { %v188_v50 = vmax.f32 %v185_v47, 0.0  ;;  %v596_v51 = vpop.f32.mrf.mxu0 }
 0x18e   :  { %v422_v52 = vadd.f32 %v596_v51, %v538_v48  ;;  %v602_v53 = vpop.f32.mrf.mxu1 }
 0x18f   :  { %189 = vst.msk [vmem:[#allocation2] sm:$0xff] %vm35_vm1, %v188_v50  ;;  %v416_v54 = vpop.f32.mrf.mxu0  ;;  %v442_v63 = vadd.f32 %v602_v53, %v538_v48 }
 0x190   :  { %v456_v55 = vsub.f32 %v422_v52, %v754_v31  ;;  %v417_v56 = vadd.f32 %v538_v48, %v416_v54  ;;  %v436_v57 = vpop.f32.mrf.mxu1 }
 0x191   :  { %v599_v58 = vpop.f32.mrf.mxu0  ;;  %v437_v61 = vadd.f32 %v538_v48, %v436_v57  ;;  %v460_v10 = vsub.f32 %v442_v63, %v754_v31 }
 0x192   :  { %v455_v59 = vsub.f32 %v417_v56, %v754_v31  ;;  %v432_v60 = vadd.f32 %v599_v58, %v538_v48  ;;  %v605_v62 = vpop.f32.mrf.mxu1  ;;  %v464_v1 = vmul.f32 %v456_v55, %v456_v55 }
 0x193   :  { %v426_v0 = vpop.f32.mrf.mxu0  ;;  %v459_v7 = vsub.f32 %v437_v61, %v754_v31  ;;  %v452_v14 = vadd.f32 %v605_v62, %v538_v48  ;;  %v468_v20 = vmul.f32 %v460_v10, %v460_v10 }
 0x194   :  { %v463_v2 = vmul.f32 %v455_v59, %v455_v59  ;;  %v458_v3 = vsub.f32 %v432_v60, %v754_v31  ;;  %v427_v4 = vadd.f32 %v538_v48, %v426_v0  ;;  %v446_v5 = vpop.f32.mrf.mxu1  ;;  %v472_v11 = vsel %vm114_vm4, %v464_v1, 0.0 }
 0x195   :  { %v447_v9 = vadd.f32 %v538_v48, %v446_v5  ;;  %v467_v16 = vmul.f32 %v459_v7, %v459_v7  ;;  %v462_v22 = vsub.f32 %v452_v14, %v754_v31  ;;  %v480_v27 = vsel %vm114_vm4, %v468_v20, 0.0 }
 0x196   :  { %v471_v6 = vsel %vm114_vm4, %v463_v2, 0.0  ;;  %v457_v8 = vsub.f32 %v427_v4, %v754_v31  ;;  %v466_v12 = vmul.f32 %v458_v3, %v458_v3 }
 0x197   :  { %v473_v15 = vadd.f32 %v472_v11, %v471_v6  ;;  %v461_v18 = vsub.f32 %v447_v9, %v754_v31  ;;  %v478_v24 = vsel %vm114_vm4, %v467_v16, 0.0  ;;  %v470_v28 = vmul.f32 %v462_v22, %v462_v22 }
 0x198   :  { %v465_v13 = vmul.f32 %v457_v8, %v457_v8  ;;  %v476_v21 = vsel %vm114_vm4, %v466_v12, 0.0 }
 0x199   :  { %v469_v25 = vmul.f32 %v461_v18, %v461_v18  ;;  %v484_v33 = vsel %vm114_vm4, %v470_v28, 0.0 }
 0x19a   :  { %v474_v17 = vsel %vm114_vm4, %v465_v13, 0.0 }
 0x19b   :  { %v475_v19 = vadd.f32 %v474_v17, %v473_v15  ;;  %v482_v30 = vsel %vm114_vm4, %v469_v25, 0.0 }
 0x19d   :  { %v477_v23 = vadd.f32 %v476_v21, %v475_v19 }
 0x19f   :  { %v479_v26 = vadd.f32 %v478_v24, %v477_v23 }
 0x1a1   :  { %v481_v29 = vadd.f32 %v480_v27, %v479_v26 }
 0x1a3   :  { %v483_v32 = vadd.f32 %v482_v30, %v481_v29 }
 0x1a5   :  { %v485_v34 = vadd.f32 %v484_v33, %v483_v32 }
 0x1a7   :  { %486 = vadd.xlane.f32.xlu0 %v485_v34 }
 0x1a8   :  { %628 = shalt.err (!%p625_p4)
}
 0x1a9   :  { %507 = dma.vmem_to_hbm [thread:$0]  %s505_s28, 128, %s804_s3, [#allocation3]  }
 0x1aa   :  { %s653_s8 = smov [#allocation5]  }
 0x230   :  { %v487_v31 = vpop.xlane.xlu0 %486 }
 0x231   :  { %v488_v35 = vrot.slane %v487_v31, 4 }
 0x233   :  { %v489_v36 = vadd.f32 %v488_v35, %v487_v31 }
 0x235   :  { %v490_v37 = vrot.slane %v489_v36, 2 }
 0x237   :  { %v491_v38 = vadd.f32 %v490_v37, %v489_v36 }
 0x239   :  { %v492_v39 = vrot.slane %v491_v38, 1 }
 0x23b   :  { %v493_v40 = vadd.f32 %v492_v39, %v491_v38 }
 0x23d   :  { %608 = vpush %v493_v40 }
 0x26e   :  { %s609_s6 = spop %608 }
 0x26f   :  { %s495_s7 = smul.f32 0.00048828125, %s609_s6 }
 0x271   :  { %497 = sst [smem:[#allocation5]] %s495_s7 }
 0x272   :  { %515 = dma.smem_to_hbm %s653_s8, 16, %s805_s4, [#allocation4]  }
 0x273   :  { %645 = dma.done.wait [#allocation3], 128  }
 0x274   :  { %646 = vsyncadd [#allocation3], 4294967168 }
 0x275   :  { %647 = dma.done.wait [#allocation4], 16  }
 0x276   :  { %648 = vsyncadd [#allocation4], 4294967280 }
 0x277   :  { %522 = sfence }
 0x278   :  { %523 = vsyncpa [#allocation3], 1 }
 0x279   :  { %524 = vsyncpa [#allocation4], 1 }

</bundles_post_ra>
